<compile_context>
chip_gen: v6e
topology: v6e:2x2x1
jax: 0.10.0
libtpu: 0.0.40
codegen_flags: <defaults>
</compile_context>

<pallas_src>
import jax
import jax.numpy as jnp
from jax.experimental import pallas as pl
from jax.experimental.pallas import tpu as pltpu


# ---------------------------------------------------------------------------
# Kernel
# ---------------------------------------------------------------------------
def _mel_shift_kernel(x_ref, w_ref, b_ref, o_ref):
    """Fused 5-linear chain with ReLU + residuals for one (tm, Cp) row tile.

    x_ref: (tm, Cp) f32 activations
    w_ref: (5, Cp, Cp) bf16 pre-transposed weights (y = v @ w)
    b_ref: (5, 1, Cp) f32 biases
    o_ref: (tm, Cp) f32 output
    """
    x = x_ref[...].astype(jnp.float32)

    def linear(v, layer):
        # bf16 x bf16 -> f32 accumulate on the MXU.
        return jnp.dot(v.astype(jnp.bfloat16), w_ref[layer],
                       preferred_element_type=jnp.float32) + b_ref[layer]

    # x = relu(fc(x)) + x
    x = jnp.maximum(linear(x, 0), 0.0) + x
    # x = relu(fc1(x) + x)
    x = jnp.maximum(linear(x, 1) + x, 0.0)
    # x = relu(fc2(x) + x)
    x = jnp.maximum(linear(x, 2) + x, 0.0)
    # x = relu(fc3(x) + x)
    x = jnp.maximum(linear(x, 3) + x, 0.0)
    # x = fc_out(x)
    o_ref[...] = linear(x, 4).astype(o_ref.dtype)


# ---------------------------------------------------------------------------
# Wrapper
# ---------------------------------------------------------------------------
def _round_up(n, m):
    return ((n + m - 1) // m) * m


def _choose_tiling(M, tile_m):
    """Pick a sublane-aligned row tile; prefer >= 2 grid steps (v7x megacore)."""
    half = _round_up(max(M // 2, 8), 8)
    tm = max(min(_round_up(tile_m, 8), half), 8)
    m_pad = _round_up(M, tm)
    return tm, m_pad


def prepare_params(params, in_channels):
    """One-time parameter prep (hoisted out of the forward call).

    Transposes PyTorch-convention (out, in) weights to (in, out), zero-pads the
    feature dim to a multiple of 128 lanes, stacks all 5 layers, and casts the
    weights to bf16 (biases stay f32).
    """
    C = in_channels
    Cp = _round_up(C, 128)
    ws, bs = [], []
    for name in ("fc", "fc1", "fc2", "fc3", "fc_out"):
        w, b = params[name]
        wt = jnp.zeros((Cp, Cp), jnp.float32).at[:C, :C].set(
            jnp.asarray(w, jnp.float32).T)
        bp = jnp.zeros((Cp,), jnp.float32).at[:C].set(
            jnp.asarray(b, jnp.float32))
        ws.append(wt)
        bs.append(bp)
    w_stack = jnp.stack(ws).astype(jnp.bfloat16)   # (5, Cp, Cp)
    b_stack = jnp.stack(bs)[:, None, :]            # (5, 1, Cp) f32
    return w_stack, b_stack


def mel_shift_network(x, prepped, *, tile_m=256):
    """x: (B, T, C) float32.  prepped: output of prepare_params."""
    B, T, C = x.shape
    w_stack, b_stack = prepped
    Cp = w_stack.shape[-1]

    M = B * T
    tm, M_pad = _choose_tiling(M, tile_m)
    grid_m = M_pad // tm

    # Zero-pad rows to a tile multiple and lanes to Cp (padded lanes stay zero
    # through the whole chain because padded weight rows/cols and biases are 0).
    x2d = x.reshape(M, C)
    x_p = jnp.zeros((M_pad, Cp), x.dtype).at[:M, :C].set(x2d)

    x_spec = pl.BlockSpec((tm, Cp), lambda i: (i, 0))
    w_spec = pl.BlockSpec((5, Cp, Cp), lambda i: (0, 0, 0))   # whole, resident
    b_spec = pl.BlockSpec((5, 1, Cp), lambda i: (0, 0, 0))    # whole, resident
    out_spec = pl.BlockSpec((tm, Cp), lambda i: (i, 0))

    flops = 2 * M_pad * Cp * Cp * 5
    bytes_accessed = (M_pad * Cp * 4 * 2        # activations in + out (f32)
                      + 5 * Cp * Cp * 2         # bf16 weights
                      + 5 * Cp * 4)             # f32 biases

    out2d = pl.pallas_call(
        _mel_shift_kernel,
        out_shape=jax.ShapeDtypeStruct((M_pad, Cp), x.dtype),
        grid_spec=pltpu.PrefetchScalarGridSpec(
            num_scalar_prefetch=0,
            grid=(grid_m,),
            in_specs=[x_spec, w_spec, b_spec],
            out_specs=out_spec,
        ),
        compiler_params=pltpu.CompilerParams(
            dimension_semantics=("parallel",),
        ),
        cost_estimate=pl.CostEstimate(
            flops=flops, transcendentals=0, bytes_accessed=bytes_accessed),
    )(x_p, w_stack, b_stack)

    return out2d[:M, :C].reshape(B, T, C)


# ---------------------------------------------------------------------------
# Parameters / reference
# ---------------------------------------------------------------------------
def init_params(key, in_channels):
    """Deterministic synthetic parameters with PyTorch nn.Linear-like scaling."""
    names = ("fc", "fc1", "fc2", "fc3", "fc_out")
    params = {}
    bound = 1.0 / jnp.sqrt(in_channels)
    keys = jax.random.split(key, 2 * len(names))
    for i, name in enumerate(names):
        wk, bk = keys[2 * i], keys[2 * i + 1]
        w = jax.random.uniform(wk, (in_channels, in_channels),
                               jnp.float32, -bound, bound)   # (out, in)
        b = jax.random.uniform(bk, (in_channels,), jnp.float32, -bound, bound)
        params[name] = (w, b)
    return params


def reference_forward(x, params):
    """Pure-JAX f32 reference of the PyTorch forward.

    The TransformerEncoder calls are omitted: their outputs are discarded
    (overwritten before use) so they do not affect the result.
    """
    def lin(v, name):
        w, b = params[name]
        return v @ w.T + b

    x1 = jax.nn.relu(lin(x, "fc")) + x
    x2 = jax.nn.relu(lin(x1, "fc1") + x1)
    x3 = jax.nn.relu(lin(x2, "fc2") + x2)
    x4 = jax.nn.relu(lin(x3, "fc3") + x3)
    return lin(x4, "fc_out")


# ---------------------------------------------------------------------------
# Demo
# ---------------------------------------------------------------------------
if __name__ == "__main__":
    in_channels = 32     # small, divisible by nhead=2 (module default is 80)
    batch, seq_len = 2, 8

    key = jax.random.PRNGKey(0)
    kx, kp = jax.random.split(key)
    x = jax.random.normal(kx, (batch, seq_len, in_channels), jnp.float32)
    params = init_params(kp, in_channels)

    prepped = prepare_params(params, in_channels)   # one-time prep
    out = mel_shift_network(x, prepped)
    out = jax.block_until_ready(out)

    ref = reference_forward(x, params)
    assert out.shape == (batch, seq_len, in_channels)

    # bf16 matmul inputs with f32 accumulation -> relaxed tolerance vs f32 ref.
    err = float(jnp.max(jnp.abs(out - ref)))
    scale = float(jnp.max(jnp.abs(ref))) + 1e-6
    assert err <= 5e-2 * max(1.0, scale), f"mismatch vs reference: err={err}"

    print("KERNEL_OK")
</pallas_src>

<mosaic_0001>
module attributes {stable_mosaic.version = 11 : i64} {
  func.func @_mel_shift_kernel(%arg0: i32, %arg1: memref<8x128xf32, #tpu.memory_space<vmem>>, %arg2: memref<5x128x128xbf16, #tpu.memory_space<vmem>>, %arg3: memref<5x1x128xf32, #tpu.memory_space<vmem>>, %arg4: memref<8x128xf32, #tpu.memory_space<vmem>>) attributes {dimension_semantics = [#tpu.dimension_semantics<parallel>], iteration_bounds = array<i64: 2>, scalar_prefetch = 0 : i64, scratch_operands = 0 : i64, tpu.core_type = #tpu.core_type<tc>, window_params = [{transform_indices = @transform_0, window_bounds = array<i64: 8, 128>}, {pipeline_mode = #tpu.pipeline_mode<synchronous>, transform_indices = @transform_1, window_bounds = array<i64: 5, 128, 128>}, {pipeline_mode = #tpu.pipeline_mode<synchronous>, transform_indices = @transform_2, window_bounds = array<i64: 5, 1, 128>}, {transform_indices = @transform_3, window_bounds = array<i64: 8, 128>}]} {
    %c0 = arith.constant 0 : index
    %c0_0 = arith.constant 0 : index
    %0 = vector.load %arg1[%c0, %c0_0] : memref<8x128xf32, #tpu.memory_space<vmem>>, vector<8x128xf32>
    %1 = arith.truncf %0 : vector<8x128xf32> to vector<8x128xbf16>
    %c0_1 = arith.constant 0 : index
    %c0_2 = arith.constant 0 : index
    %c0_3 = arith.constant 0 : index
    %2 = vector.load %arg2[%c0_1, %c0_2, %c0_3] : memref<5x128x128xbf16, #tpu.memory_space<vmem>>, vector<1x128x128xbf16>
    %3 = vector.shape_cast %2 : vector<1x128x128xbf16> to vector<128x128xbf16>
    %cst = arith.constant dense<0.000000e+00> : vector<8x128xf32>
    %4 = tpu.matmul %1, %3, %cst {dimension_numbers = #tpu.dot_dimension_numbers<[1], [0], [0], [1], [0, 0, 1, 1], [], []>} : vector<8x128xbf16>, vector<128x128xbf16>, vector<8x128xf32> -> vector<8x128xf32>
    %c0_4 = arith.constant 0 : index
    %c0_5 = arith.constant 0 : index
    %c0_6 = arith.constant 0 : index
    %5 = vector.load %arg3[%c0_4, %c0_5, %c0_6] : memref<5x1x128xf32, #tpu.memory_space<vmem>>, vector<1x1x128xf32>
    %6 = vector.shape_cast %5 : vector<1x1x128xf32> to vector<1x128xf32>
    %7 = vector.broadcast %6 : vector<1x128xf32> to vector<8x128xf32>
    %8 = arith.addf %4, %7 : vector<8x128xf32>
    %cst_7 = arith.constant 0.000000e+00 : f32
    %9 = vector.broadcast %cst_7 : f32 to vector<8x128xf32>
    %10 = arith.maximumf %8, %9 : vector<8x128xf32>
    %11 = arith.addf %10, %0 : vector<8x128xf32>
    %12 = arith.truncf %11 : vector<8x128xf32> to vector<8x128xbf16>
    %c1 = arith.constant 1 : index
    %c0_8 = arith.constant 0 : index
    %c0_9 = arith.constant 0 : index
    %13 = vector.load %arg2[%c1, %c0_8, %c0_9] : memref<5x128x128xbf16, #tpu.memory_space<vmem>>, vector<1x128x128xbf16>
    %14 = vector.shape_cast %13 : vector<1x128x128xbf16> to vector<128x128xbf16>
    %cst_10 = arith.constant dense<0.000000e+00> : vector<8x128xf32>
    %15 = tpu.matmul %12, %14, %cst_10 {dimension_numbers = #tpu.dot_dimension_numbers<[1], [0], [0], [1], [0, 0, 1, 1], [], []>} : vector<8x128xbf16>, vector<128x128xbf16>, vector<8x128xf32> -> vector<8x128xf32>
    %c1_11 = arith.constant 1 : index
    %c0_12 = arith.constant 0 : index
    %c0_13 = arith.constant 0 : index
    %16 = vector.load %arg3[%c1_11, %c0_12, %c0_13] : memref<5x1x128xf32, #tpu.memory_space<vmem>>, vector<1x1x128xf32>
    %17 = vector.shape_cast %16 : vector<1x1x128xf32> to vector<1x128xf32>
    %18 = vector.broadcast %17 : vector<1x128xf32> to vector<8x128xf32>
    %19 = arith.addf %15, %18 : vector<8x128xf32>
    %20 = arith.addf %19, %11 : vector<8x128xf32>
    %cst_14 = arith.constant 0.000000e+00 : f32
    %21 = vector.broadcast %cst_14 : f32 to vector<8x128xf32>
    %22 = arith.maximumf %20, %21 : vector<8x128xf32>
    %23 = arith.truncf %22 : vector<8x128xf32> to vector<8x128xbf16>
    %c2 = arith.constant 2 : index
    %c0_15 = arith.constant 0 : index
    %c0_16 = arith.constant 0 : index
    %24 = vector.load %arg2[%c2, %c0_15, %c0_16] : memref<5x128x128xbf16, #tpu.memory_space<vmem>>, vector<1x128x128xbf16>
    %25 = vector.shape_cast %24 : vector<1x128x128xbf16> to vector<128x128xbf16>
    %cst_17 = arith.constant dense<0.000000e+00> : vector<8x128xf32>
    %26 = tpu.matmul %23, %25, %cst_17 {dimension_numbers = #tpu.dot_dimension_numbers<[1], [0], [0], [1], [0, 0, 1, 1], [], []>} : vector<8x128xbf16>, vector<128x128xbf16>, vector<8x128xf32> -> vector<8x128xf32>
    %c2_18 = arith.constant 2 : index
    %c0_19 = arith.constant 0 : index
    %c0_20 = arith.constant 0 : index
    %27 = vector.load %arg3[%c2_18, %c0_19, %c0_20] : memref<5x1x128xf32, #tpu.memory_space<vmem>>, vector<1x1x128xf32>
    %28 = vector.shape_cast %27 : vector<1x1x128xf32> to vector<1x128xf32>
    %29 = vector.broadcast %28 : vector<1x128xf32> to vector<8x128xf32>
    %30 = arith.addf %26, %29 : vector<8x128xf32>
    %31 = arith.addf %30, %22 : vector<8x128xf32>
    %cst_21 = arith.constant 0.000000e+00 : f32
    %32 = vector.broadcast %cst_21 : f32 to vector<8x128xf32>
    %33 = arith.maximumf %31, %32 : vector<8x128xf32>
    %34 = arith.truncf %33 : vector<8x128xf32> to vector<8x128xbf16>
    %c3 = arith.constant 3 : index
    %c0_22 = arith.constant 0 : index
    %c0_23 = arith.constant 0 : index
    %35 = vector.load %arg2[%c3, %c0_22, %c0_23] : memref<5x128x128xbf16, #tpu.memory_space<vmem>>, vector<1x128x128xbf16>
    %36 = vector.shape_cast %35 : vector<1x128x128xbf16> to vector<128x128xbf16>
    %cst_24 = arith.constant dense<0.000000e+00> : vector<8x128xf32>
    %37 = tpu.matmul %34, %36, %cst_24 {dimension_numbers = #tpu.dot_dimension_numbers<[1], [0], [0], [1], [0, 0, 1, 1], [], []>} : vector<8x128xbf16>, vector<128x128xbf16>, vector<8x128xf32> -> vector<8x128xf32>
    %c3_25 = arith.constant 3 : index
    %c0_26 = arith.constant 0 : index
    %c0_27 = arith.constant 0 : index
    %38 = vector.load %arg3[%c3_25, %c0_26, %c0_27] : memref<5x1x128xf32, #tpu.memory_space<vmem>>, vector<1x1x128xf32>
    %39 = vector.shape_cast %38 : vector<1x1x128xf32> to vector<1x128xf32>
    %40 = vector.broadcast %39 : vector<1x128xf32> to vector<8x128xf32>
    %41 = arith.addf %37, %40 : vector<8x128xf32>
    %42 = arith.addf %41, %33 : vector<8x128xf32>
    %cst_28 = arith.constant 0.000000e+00 : f32
    %43 = vector.broadcast %cst_28 : f32 to vector<8x128xf32>
    %44 = arith.maximumf %42, %43 : vector<8x128xf32>
    %45 = arith.truncf %44 : vector<8x128xf32> to vector<8x128xbf16>
    %c4 = arith.constant 4 : index
    %c0_29 = arith.constant 0 : index
    %c0_30 = arith.constant 0 : index
    %46 = vector.load %arg2[%c4, %c0_29, %c0_30] : memref<5x128x128xbf16, #tpu.memory_space<vmem>>, vector<1x128x128xbf16>
    %47 = vector.shape_cast %46 : vector<1x128x128xbf16> to vector<128x128xbf16>
    %cst_31 = arith.constant dense<0.000000e+00> : vector<8x128xf32>
    %48 = tpu.matmul %45, %47, %cst_31 {dimension_numbers = #tpu.dot_dimension_numbers<[1], [0], [0], [1], [0, 0, 1, 1], [], []>} : vector<8x128xbf16>, vector<128x128xbf16>, vector<8x128xf32> -> vector<8x128xf32>
    %c4_32 = arith.constant 4 : index
    %c0_33 = arith.constant 0 : index
    %c0_34 = arith.constant 0 : index
    %49 = vector.load %arg3[%c4_32, %c0_33, %c0_34] : memref<5x1x128xf32, #tpu.memory_space<vmem>>, vector<1x1x128xf32>
    %50 = vector.shape_cast %49 : vector<1x1x128xf32> to vector<1x128xf32>
    %51 = vector.broadcast %50 : vector<1x128xf32> to vector<8x128xf32>
    %52 = arith.addf %48, %51 : vector<8x128xf32>
    %c0_35 = arith.constant 0 : index
    %c0_36 = arith.constant 0 : index
    %53 = vector.load %arg4[%c0_35, %c0_36] : memref<8x128xf32, #tpu.memory_space<vmem>>, vector<8x128xf32>
    tpu.vector_store %arg4[%c0_35, %c0_36], %52 {strides = array<i32>} : memref<8x128xf32, #tpu.memory_space<vmem>>, vector<8x128xf32>,
    return
  }
  func.func @transform_0(%arg0: i32) -> (i32, i32) {
    %c0_i32 = arith.constant 0 : i32
    %c0_i32_0 = arith.constant 0 : i32
    return %arg0, %c0_i32 : i32, i32
  }
  func.func @transform_1(%arg0: i32) -> (i32, i32, i32) {
    %c0_i32 = arith.constant 0 : i32
    %c0_i32_0 = arith.constant 0 : i32
    %c0_i32_1 = arith.constant 0 : i32
    %c0_i32_2 = arith.constant 0 : i32
    return %c0_i32, %c0_i32_0, %c0_i32_1 : i32, i32, i32
  }
  func.func @transform_2(%arg0: i32) -> (i32, i32, i32) {
    %c0_i32 = arith.constant 0 : i32
    %c0_i32_0 = arith.constant 0 : i32
    %c0_i32_1 = arith.constant 0 : i32
    %c0_i32_2 = arith.constant 0 : i32
    return %c0_i32, %c0_i32_0, %c0_i32_1 : i32, i32, i32
  }
  func.func @transform_3(%arg0: i32) -> (i32, i32) {
    %c0_i32 = arith.constant 0 : i32
    %c0_i32_0 = arith.constant 0 : i32
    return %arg0, %c0_i32 : i32, i32
  }
}

</mosaic_0001>

<bundles_post_ra>
// kernel: tpu_custom_call.1
= control target key start
LH: loop header
LB: loop body
LE: loop exit
PB: predicated region body
PF: predicated region fallthrough
CT: control target
= control target key end

     0   :  { %8 = vsyncpa [#allocation3], 0  ;;  %s1638_s0 = inlined_call_operand.hbm [shape: f32[16,128], index: 0, kind: input, shape index: {}]   ;;  %s1639_s1 = inlined_call_operand.hbm [shape: bf16[5,128,128], index: 1, kind: input, shape index: {}]   ;;  %s1640_s2 = inlined_call_operand.hbm [shape: f32[5,1,128], index: 2, kind: input, shape index: {}]   ;;  %s1641_s3 = inlined_call_operand.hbm [shape: f32[16,128], index: 3, kind: output, shape index: {}]  }
   0x1   :  { %10 = vsyncpa [#allocation3 + $0x1], 0 }
   0x2   :  { %11 = vsyncpa [#allocation6], 0 }
   0x3   :  { %12 = vsyncpa [#allocation4], 0 }
   0x4   :  { %14 = vsyncpa [#allocation4 + $0x1], 0  ;;  %s1396_s12 = smov 0   ;;  %s1398_s13 = smov 0  }
   0x5   :  { %s1400_s14 = smov 0   ;;  %s1402_s15 = smov 0  }
   0x6 LB: > { %s1417_s16 = sadd.s32 4294967295, %s1364_s15   ;;  %s897_s17 = sadd.s32 4294967294, %s1364_s15   ;;  %s1364_s15 = sphi %s1402_s15, %s1662_s15   ;;  %s1360_s14 = sphi %s1400_s14, %s1661_s14   ;;  %s1356_s13 = sphi %s1398_s13, %s1660_s13   ;;  %s1352_s12 = sphi %s1396_s12, %s1659_s12  }
   0x7   : > { %p40_p0 = scmp.ne.s32.totalorder %s1356_s13, %s1352_s12  ;;  %p1642_p1 = scmp.eq.s32.totalorder %s1417_s16, 0 }
   0x8   : > { %p106_p2 = scmp.eq.s32.totalorder %s1417_s16, 1  ;;  %p112_p3 = scmp.eq.s32.totalorder %s897_s17, 1 }
   0x9   : > { %p1426_p4 = por %p1642_p1, %p40_p0  ;;  %p898_p5 = scmp.ge.s32.totalorder %s1364_s15, 1 }
   0xa   : > { %p1431_p6 = por %p112_p3, %p40_p0  ;;  %p119_p7 = scmp.lt.s32.totalorder %s1364_s15, 3 }
   0xb   : > { %s1646_s18 = scalar_select %p1426_p4, 1, 0 }
   0xc   : > { %s1647_s19 = scalar_select %p1431_p6, 1, 0 }
   0xd   : > { %p1436_p8 = pnand %p898_p5, %p119_p7  ;;  %s1366_s21 = smov [#allocation5]  }
   0xe   : > { %s131_s22 = sshll.u32 %s1366_s21, 4  ;;  %s1367_s24 = smov [#allocation7]   ;;  %s132_s22 = int_to_ptr.vmem [resolvable:$true] %s131_s22 }
   0xf   : > { %s1648_s20 = scalar_select %p1436_p8, 1, 0 }
  0x10   : > { %p1115_p9 = pneg %p1436_p8  ;;  %s144_s25 = sshll.u32 %s1367_s24, 4  ;;  %s1449_s25 = int_to_ptr.vmem [resolvable:$true] %s144_s25 }
  0x11   : > { %s1227_s26 = scalar_lea.vmem %s132_s22, 5120  ;;  %p1235_p5 = scmp.lt.s32.totalorder %s132_s22, %s132_s22 }
  0x12   : > { %p1445_p11 = pnand %p1115_p9, %p1642_p1  ;;  %p1228_p13 = scmp.ne.s32.totalorder %s132_s22, %s1227_s26 }
  0x13   : > { %p1236_p7 = scmp.lt.s32.totalorder %s1227_s26, %s1227_s26 }
  0x14   : > { %p1218_p12 = pneg %p1445_p11 }
  0x15   : > { %p1237_p9 = por %p1236_p7, %p1235_p5 }
  0x16   : > { %p1230_p0 = pnand %p1228_p13, %p1218_p12 }
  0x18   : > { %p1231_p3 = pneg %p1230_p0 }
  0x1a   : > { %p1238_p10 = pnand %p1237_p9, %p1231_p3 }
  0x1c   : > { %1241 = shalt.err (!%p1238_p10)
}
  0x1d   : > { %s1368_s27 = smov 64   ;;  %s1369_s28 = smov 4  }
  0x1e   : > { %1118 = dma.hbm_to_vmem [thread:$0]  (!%p1445_p11), %s1639_s1, 5120, %s132_s22, [#allocation6], %s1368_s27, %s1368_s27, %s1369_s28  }
  0x1f   : > { %s1253_s4 = scalar_lea.vmem %s1449_s25, 80  ;;  %s1260_s5 = scalar_lea.vmem %s1449_s25, 96 }
  0x20   : > { %p1254_p13 = scmp.ne.s32.totalorder %s1449_s25, %s1253_s4  ;;  %p1261_p10 = scmp.lt.s32.totalorder %s1449_s25, %s1449_s25 }
  0x21   : > { %p1262_p5 = scmp.lt.s32.totalorder %s1260_s5, %s1253_s4 }
  0x22   : > { %p1256_p0 = pnand %p1254_p13, %p1218_p12 }
  0x23   : > { %p1263_p7 = por %p1262_p5, %p1261_p10 }
  0x24   : > { %p1257_p3 = pneg %p1256_p0 }
  0x26   : > { %p1264_p9 = pnand %p1263_p7, %p1257_p3 }
  0x28   : > { %1267 = shalt.err (!%p1264_p9)
}
  0x29   : > { %s1370_s6 = smov 16   ;;  %s1371_s7 = smov 1  }
  0x2a   : > { %1121 = dma.hbm_to_vmem [thread:$0]  (!%p1445_p11), %s1640_s2, 80, %s1449_s25, [#allocation6], %s1370_s6, %s1370_s6, %s1371_s7  }
  0x2b   : > { %s1476_s10 = sadd.s32 1, %s1364_s15   ;;  %s27_s17 = sadd.s32 1, %s1360_s14 }
  0x2c   : > { %s24_s11 = ssub.s32 %s1364_s15, %s1476_s10  ;;  %p34_p13 = scmp.ne.s32.totalorder %s1360_s14, %s1356_s13 }
  0x2d   : > { %p25_p12 = scmp.eq.s32.totalorder %s24_s11, 0  ;;  %p35_p0 = scmp.eq.s32.totalorder %s1364_s15, 0 }
  0x2e   : > { %p1489_p10 = por %p106_p2, %p34_p13  ;;  %p1132_p5 = scmp.lt.s32.totalorder %s1364_s15, 2 }
  0x2f   : > { %s1485_s21 = scalar_select %p25_p12, %s1360_s14, %s27_s17  }
  0x30   : > { %p36_p3 = por %p35_p0, %p34_p13  ;;  %s158_s23 = sand.u32 1, %s1360_s14  }
  0x31   : > { %s1650_s22 = scalar_select %p1489_p10, 1, 0 }
  0x32   : > { %s902_s24 = sshll.u32 %s158_s23, 3  ;;  %s903_s25 = sshll.u32 %s1364_s15, 7 }
  0x33   : > { %s1499_s28 = scalar_lea.hbm %s1638_s0, %s903_s25  ;;  %s162_s29 = scalar_lea.vmem [#allocation2], %s902_s24 }
  0x34   : > { %s169_s30 = sshll.u32 %s162_s29, 4  ;;  %p1501_p11 = pnand %p1132_p5, %p36_p3  ;;  %s170_s30 = int_to_ptr.vmem [resolvable:$true] %s169_s30 }
  0x35   : > { %s159_s5 = scalar_lea.sflag [#allocation3], %s158_s23  ;;  %s1268_s6 = scalar_lea.hbm %s1499_s28, 128 }
  0x36   : > { %p1269_p2 = scmp.ne.s32.totalorder %s1499_s28, %s1268_s6  ;;  %p1270_p7 = pneg %p1501_p11 }
  0x37   : > { %s1273_s9 = scalar_lea.hbm %s1638_s0, 256  ;;  %p1274_p13 = scmp.lt.s32.totalorder %s1499_s28, %s1638_s0 }
  0x38   : > { %p1271_p9 = pnand %p1270_p7, %p1269_p2  ;;  %p1275_p0 = scmp.lt.s32.totalorder %s1273_s9, %s1268_s6 }
  0x3a   : > { %p1272_p12 = pneg %p1271_p9  ;;  %p1276_p3 = por %p1275_p0, %p1274_p13 }
  0x3c   : > { %p1277_p5 = pnand %p1276_p3, %p1272_p12 }
  0x3e   : > { %1280 = shalt.err (!%p1277_p5)
}
  0x3f   : > { %s1281_s24 = scalar_lea.vmem %s170_s30, 128  ;;  %s1372_s23 = smov [#allocation2]  }
  0x40   : > { %p1282_p1 = scmp.ne.s32.totalorder %s170_s30, %s1281_s24  ;;  %s1286_s25 = sshll.u32 %s1372_s23, 4  ;;  %s1287_s25 = int_to_ptr.vmem [resolvable:$false] %s1286_s25 }
  0x41   : > { %s1288_s26 = scalar_lea.vmem %s1287_s25, 256  ;;  %p1289_p2 = scmp.lt.s32.totalorder %s170_s30, %s1287_s25 }
  0x42   : > { %p1284_p6 = pnand %p1282_p1, %p1270_p7  ;;  %p1290_p9 = scmp.lt.s32.totalorder %s1288_s26, %s1281_s24 }
  0x44   : > { %p1285_p10 = pneg %p1284_p6  ;;  %p1291_p4 = por %p1290_p9, %p1289_p2 }
  0x46   : > { %p1292_p8 = pnand %p1291_p4, %p1285_p10 }
  0x48   : > { %1295 = shalt.err (!%p1292_p8)
}
  0x49   : > { %1125 = dma.hbm_to_vmem [thread:$0]  (!%p1501_p11), %s1499_s28, 128, %s170_s30, %s159_s5  }
  0x4a   : > { %p1652_p12 = scmp.ne.s32.totalorder %s1648_s20, 0 }
  0x4b   : > { %s1522_s27 = sand.u32 (!%p1652_p12), 1, %s1356_s13   ;;  %p1653_p1 = scmp.ne.s32.totalorder (!%p1652_p12), %s1646_s18, 0 }
  0x4c   : > { %178 = sbr.rel (%p1652_p12) target bundleno = 1132 (0x46c), region = 32  ;;  %s905_s29 = sshll.u32 (!%p1652_p12), %s1522_s27, 3 }
  0x4d   : > { %s181_s6 = scalar_lea.sflag (!%p1652_p12), [#allocation3], %s1522_s27  ;;  %s1528_s7 = scalar_lea.vmem (!%p1652_p12), [#allocation2], %s905_s29 }
  0x51   : > { %1339 = dma.done.wait (%p1653_p1), %s181_s6, 128  }
  0x52   : > { %1341 = vsyncadd (%p1653_p1), %s181_s6, 4294967168  ;;  %p1654_p4 = scmp.eq.s32.totalorder %s1417_s16, 0 }
  0x54   : > { %1343 = dma.done.wait (%p1654_p4), [#allocation6], 5200   ;;  %p1655_p6 = pmov %p1654_p4 }
  0x55   : > { %v1373_v0 = vmov 0.0   ;;  %vm1374_vm0 = vmmov 0   ;;  %v1176_v1 = vld [vmem:[#allocation5 + $0x38] sm:$0xff]   ;;  %v1177_v2 = vld [vmem:[#allocation5 + $0x30] sm:$0xff]   ;;  %v1178_v3 = vld [vmem:[#allocation5 + $0x28] sm:$0xff]   ;;  %s955_s18 = sshll.u32 %s1417_s16, 7 }
  0x56   : > { %1345 = vsyncadd (%p1655_p6), [#allocation6], 4294962096  ;;  %1003 = vmatprep.subr.bf16.mxu0 %v1373_v0  ;;  %1019 = vmatprep.mubr.msk.bf16.mxu0 %vm1374_vm0, %v1373_v0  ;;  %v1184_v4 = vld [vmem:[#allocation5 + $0x78] sm:$0xff]   ;;  %v1179_v5 = vld [vmem:[#allocation5 + $0x20] sm:$0xff]   ;;  %s214_s20 = scalar_lea.vmem [#allocation8], %s905_s29  ;;  %s1595_s5 = scalar_lea.hbm %s1641_s3, %s955_s18 }
  0x57   : > { %1023 = vmatprep.subr.bf16.mxu1 %v1373_v0  ;;  %1039 = vmatprep.mubr.msk.bf16.mxu1 %vm1374_vm0, %v1373_v0  ;;  %v1185_v6 = vld [vmem:[#allocation5 + $0x70] sm:$0xff]   ;;  %v1180_v7 = vld [vmem:[#allocation5 + $0x18] sm:$0xff]   ;;  %v1186_v8 = vld [vmem:[#allocation5 + $0x68] sm:$0xff]   ;;  %s808_s28 = sshll.u32 %s214_s20, 4  ;;  %s795_s8 = scalar_lea.sflag [#allocation4], %s1522_s27  ;;  %s1597_s28 = int_to_ptr.vmem [resolvable:$true] %s808_s28 }
  0x58   : > { %1004 = vmatpush3.bf16.msra.mxu0 %v1176_v1  ;;  %1024 = vmatpush3.bf16.msra.mxu1 %v1184_v4  ;;  %v1181_v9 = vld [vmem:[#allocation5 + $0x10] sm:$0xff]   ;;  %v1187_v10 = vld [vmem:[#allocation5 + $0x60] sm:$0xff]   ;;  %v1182_v11 = vld [vmem:[#allocation5 + $0x8] sm:$0xff]   ;;  %s1296_s16 = scalar_lea.vmem %s1597_s28, 128  ;;  %p1656_p10 = scmp.ne.s32.totalorder %s1650_s22, 0 }
  0x59   : > { %1005 = vmatprep.subr.bf16.mxu0 %v1373_v0  ;;  %1025 = vmatprep.subr.bf16.mxu1 %v1373_v0  ;;  %v1188_v12 = vld [vmem:[#allocation5 + $0x58] sm:$0xff]   ;;  %v1183_v13 = vld [vmem:[#allocation5] sm:$0xff]   ;;  %v1189_v15 = vld [vmem:[#allocation5 + $0x50] sm:$0xff]   ;;  %p1297_p8 = scmp.ne.s32.totalorder %s1597_s28, %s1296_s16  ;;  %s1375_s9 = smov [#allocation8]  }
  0x5a   : > { %v216_v14 = vld [vmem:[%s1528_s7] sm:$0xff]  ;;  %v1190_v17 = vld [vmem:[#allocation5 + $0x48] sm:$0xff]   ;;  %v1191_v18 = vld [vmem:[#allocation5 + $0x40] sm:$0xff]   ;;  %s1300_s11 = sshll.u32 %s1375_s9, 4  ;;  %s1301_s11 = int_to_ptr.vmem [resolvable:$false] %s1300_s11 }
  0x5b   : > { %v217_v16 = vpack.c.bf16 %v216_v14, %v216_v14  ;;  %v1192_v19 = vld [vmem:[#allocation5 + $0xb8] sm:$0xff]   ;;  %v1193_v20 = vld [vmem:[#allocation5 + $0xb0] sm:$0xff]   ;;  %v1194_v21 = vld [vmem:[#allocation5 + $0xa8] sm:$0xff]   ;;  %p1298_p11 = pnand %p1297_p8, %p1656_p10  ;;  %s1302_s17 = scalar_lea.vmem %s1301_s11, 256 }
  0x5c   : > { %1006 = vmatpush3.bf16.msra.mxu0 %v1177_v2  ;;  %1026 = vmatpush3.bf16.msra.mxu1 %v1185_v6  ;;  %v1195_v22 = vld [vmem:[#allocation5 + $0xa0] sm:$0xff]   ;;  %v1196_v23 = vld [vmem:[#allocation5 + $0x98] sm:$0xff]   ;;  %v1197_v24 = vld [vmem:[#allocation5 + $0x90] sm:$0xff]   ;;  %p1303_p13 = scmp.lt.s32.totalorder %s1597_s28, %s1301_s11  ;;  %p1304_p0 = scmp.lt.s32.totalorder %s1302_s17, %s1296_s16 }
  0x5d   : > { %1007 = vmatprep.subr.bf16.mxu0 %v1373_v0  ;;  %1027 = vmatprep.subr.bf16.mxu1 %v1373_v0  ;;  %v909_v25 = vld [vmem:[#allocation7] ss:$0 sm:$0xff]  ;;  %v1198_v34 = vld [vmem:[#allocation5 + $0x88] sm:$0xff]   ;;  %v1200_v36 = vld [vmem:[#allocation5 + $0xf8] sm:$0xff]   ;;  %p1299_p7 = pneg %p1298_p11 }
  0x5e   : > { %v1199_v35 = vld [vmem:[#allocation5 + $0x80] sm:$0xff]   ;;  %v1201_v37 = vld [vmem:[#allocation5 + $0xf0] sm:$0xff]   ;;  %v1202_v38 = vld [vmem:[#allocation5 + $0xe8] sm:$0xff]   ;;  %p1305_p3 = por %p1304_p0, %p1303_p13 }
  0x5f   : > { %v1203_v39 = vld [vmem:[#allocation5 + $0xe0] sm:$0xff]   ;;  %v1204_v40 = vld [vmem:[#allocation5 + $0xd8] sm:$0xff]   ;;  %v1205_v41 = vld [vmem:[#allocation5 + $0xd0] sm:$0xff]  }
  0x60   : > { %1008 = vmatpush3.bf16.msra.mxu0 %v1178_v3  ;;  %1028 = vmatpush3.bf16.msra.mxu1 %v1186_v8  ;;  %v918_v42 = vld [vmem:[#allocation7 + $0x1] ss:$0 sm:$0xff]  ;;  %v1206_v51 = vld [vmem:[#allocation5 + $0xc8] sm:$0xff]   ;;  %v1208_v53 = vld [vmem:[#allocation5 + $0x138] sm:$0xff]   ;;  %p1306_p5 = pnand %p1305_p3, %p1299_p7 }
  0x61   : > { %1009 = vmatprep.subr.bf16.mxu0 %v1373_v0  ;;  %1029 = vmatprep.subr.bf16.mxu1 %v1373_v0  ;;  %v1207_v52 = vld [vmem:[#allocation5 + $0xc0] sm:$0xff]   ;;  %v1209_v54 = vld [vmem:[#allocation5 + $0x130] sm:$0xff]   ;;  %v1210_v55 = vld [vmem:[#allocation5 + $0x128] sm:$0xff]  }
  0x62   : > { %v1211_v56 = vld [vmem:[#allocation5 + $0x120] sm:$0xff]   ;;  %v1212_v57 = vld [vmem:[#allocation5 + $0x118] sm:$0xff]   ;;  %v1213_v58 = vld [vmem:[#allocation5 + $0x110] sm:$0xff]  }
  0x63   : > { %v927_v59 = vld [vmem:[#allocation7 + $0x2] ss:$0 sm:$0xff] }
  0x64   : > { %1010 = vmatpush3.bf16.msra.mxu0 %v1179_v5  ;;  %1030 = vmatpush3.bf16.msra.mxu1 %v1187_v10  ;;  %v1214_v5 = vld [vmem:[#allocation5 + $0x108] sm:$0xff]   ;;  %v1215_v6 = vld [vmem:[#allocation5 + $0x100] sm:$0xff]  }
  0x65   : > { %1011 = vmatprep.subr.bf16.mxu0 %v1373_v0  ;;  %1031 = vmatprep.subr.bf16.mxu1 %v1373_v0 }
  0x68   : > { %1012 = vmatpush3.bf16.msra.mxu0 %v1180_v7  ;;  %1032 = vmatpush3.bf16.msra.mxu1 %v1188_v12  ;;  %v936_v7 = vld [vmem:[#allocation7 + $0x3] ss:$0 sm:$0xff] }
  0x69   : > { %1013 = vmatprep.subr.bf16.mxu0 %v1373_v0  ;;  %1033 = vmatprep.subr.bf16.mxu1 %v1373_v0 }
  0x6c   : > { %1014 = vmatpush3.bf16.msra.mxu0 %v1181_v9  ;;  %1034 = vmatpush3.bf16.msra.mxu1 %v1189_v15 }
  0x6d   : > { %1015 = vmatprep.subr.bf16.mxu0 %v1373_v0  ;;  %1035 = vmatprep.subr.bf16.mxu1 %v1373_v0 }
  0x70   : > { %1016 = vmatpush3.bf16.msra.mxu0 %v1182_v11  ;;  %1036 = vmatpush3.bf16.msra.mxu1 %v1190_v17 }
  0x71   : > { %1017 = vmatprep.subr.bf16.mxu0 %v1373_v0  ;;  %1037 = vmatprep.subr.bf16.mxu1 %v1373_v0 }
  0x74   : > { %1018 = vmatpush3.bf16.msra.mxu0 %v1183_v13  ;;  %1038 = vmatpush3.bf16.msra.mxu1 %v1191_v18 }
  0x75   : > { %1043 = vmatprep.subr.bf16.mxu0 %v1373_v0  ;;  %1063 = vmatprep.subr.bf16.mxu1 %v1373_v0 }
  0x77   : > { %1020 = vmatmul.mubr.bf16.vlgmr.msra.gmra.mxu0 %v217_v16  ;;  %v945_v16 = vld [vmem:[#allocation7 + $0x4] ss:$0 sm:$0xff] }
  0x78   : > { %1059 = vmatprep.mubr.msk.bf16.mxu0 %vm1374_vm0, %v1373_v0  ;;  %1044 = vmatpush3.bf16.msra.mxu0 %v1192_v19 }
  0x79   : > { %1045 = vmatprep.subr.bf16.mxu0 %v1373_v0 }
  0x7c   : > { %1046 = vmatpush3.bf16.msra.mxu0 %v1193_v20 }
  0x7d   : > { %1047 = vmatprep.subr.bf16.mxu0 %v1373_v0 }
  0x80   : > { %1048 = vmatpush3.bf16.msra.mxu0 %v1194_v21 }
  0x81   : > { %1049 = vmatprep.subr.bf16.mxu0 %v1373_v0 }
  0x84   : > { %1050 = vmatpush3.bf16.msra.mxu0 %v1195_v22 }
  0x85   : > { %1051 = vmatprep.subr.bf16.mxu0 %v1373_v0 }
  0x88   : > { %1052 = vmatpush3.bf16.msra.mxu0 %v1196_v23 }
  0x89   : > { %1053 = vmatprep.subr.bf16.mxu0 %v1373_v0 }
  0x8c   : > { %1054 = vmatpush3.bf16.msra.mxu0 %v1197_v24 }
  0x8d   : > { %1055 = vmatprep.subr.bf16.mxu0 %v1373_v0 }
  0x90   : > { %1056 = vmatpush3.bf16.msra.mxu0 %v1198_v34 }
  0x91   : > { %1057 = vmatprep.subr.bf16.mxu0 %v1373_v0 }
  0x94   : > { %1058 = vmatpush3.bf16.msra.mxu0 %v1199_v35 }
  0x95   : > { %1083 = vmatprep.subr.bf16.mxu0 %v1373_v0 }
 0x137   : > { %v323_v26 = vpop.f32.mrf.mxu0 }
 0x138   : > { %v324_v27 = vadd.f32 %v909_v25, %v323_v26 }
 0x139   : > { %v1021_v28 = vpop.f32.mrf.mxu0 }
 0x13a   : > { %v329_v29 = vmax.f32 %v324_v27, 0.0 }
 0x13b   : > { %v326_v30 = vpop.f32.mrf.mxu0 }
 0x13c   : > { %v330_v31 = vadd.f32 %v329_v29, %v216_v14 }
 0x13d   : > { %v1022_v32 = vpop.f32.mrf.mxu0 }
 0x13e   : > { %v331_v33 = vpack.c.bf16 %v330_v31, %v330_v31 }
 0x140   : > { %1040 = vmatmul.mubr.bf16.vlgmr.msra.gmra.mxu1 %v331_v33 }
 0x141   : > { %1079 = vmatprep.mubr.msk.bf16.mxu1 %vm1374_vm0, %v1373_v0  ;;  %1064 = vmatpush3.bf16.msra.mxu1 %v1200_v36 }
 0x142   : > { %1065 = vmatprep.subr.bf16.mxu1 %v1373_v0 }
 0x145   : > { %1066 = vmatpush3.bf16.msra.mxu1 %v1201_v37 }
 0x146   : > { %1067 = vmatprep.subr.bf16.mxu1 %v1373_v0 }
 0x149   : > { %1068 = vmatpush3.bf16.msra.mxu1 %v1202_v38 }
 0x14a   : > { %1069 = vmatprep.subr.bf16.mxu1 %v1373_v0 }
 0x14d   : > { %1070 = vmatpush3.bf16.msra.mxu1 %v1203_v39 }
 0x14e   : > { %1071 = vmatprep.subr.bf16.mxu1 %v1373_v0 }
 0x151   : > { %1072 = vmatpush3.bf16.msra.mxu1 %v1204_v40 }
 0x152   : > { %1073 = vmatprep.subr.bf16.mxu1 %v1373_v0 }
 0x155   : > { %1074 = vmatpush3.bf16.msra.mxu1 %v1205_v41 }
 0x156   : > { %1075 = vmatprep.subr.bf16.mxu1 %v1373_v0 }
 0x159   : > { %1076 = vmatpush3.bf16.msra.mxu1 %v1206_v51 }
 0x15a   : > { %1077 = vmatprep.subr.bf16.mxu1 %v1373_v0 }
 0x15d   : > { %1078 = vmatpush3.bf16.msra.mxu1 %v1207_v52 }
 0x200   : > { %v439_v43 = vpop.f32.mrf.mxu1 }
 0x201   : > { %v440_v44 = vadd.f32 %v918_v42, %v439_v43 }
 0x202   : > { %v1041_v45 = vpop.f32.mrf.mxu1 }
 0x203   : > { %v445_v46 = vadd.f32 %v440_v44, %v330_v31 }
 0x204   : > { %v442_v47 = vpop.f32.mrf.mxu1 }
 0x205   : > { %v446_v48 = vmax.f32 %v445_v46, 0.0 }
 0x206   : > { %v1042_v49 = vpop.f32.mrf.mxu1 }
 0x207   : > { %v447_v50 = vpack.c.bf16 %v446_v48, %v446_v48 }
 0x209   : > { %1060 = vmatmul.mubr.bf16.vlgmr.msra.gmra.mxu0 %v447_v50 }
 0x20a   : > { %1099 = vmatprep.mubr.msk.bf16.mxu0 %vm1374_vm0, %v1373_v0  ;;  %1084 = vmatpush3.bf16.msra.mxu0 %v1208_v53 }
 0x20b   : > { %1085 = vmatprep.subr.bf16.mxu0 %v1373_v0 }
 0x20e   : > { %1086 = vmatpush3.bf16.msra.mxu0 %v1209_v54 }
 0x20f   : > { %1087 = vmatprep.subr.bf16.mxu0 %v1373_v0 }
 0x212   : > { %1088 = vmatpush3.bf16.msra.mxu0 %v1210_v55 }
 0x213   : > { %1089 = vmatprep.subr.bf16.mxu0 %v1373_v0 }
 0x216   : > { %1090 = vmatpush3.bf16.msra.mxu0 %v1211_v56 }
 0x217   : > { %1091 = vmatprep.subr.bf16.mxu0 %v1373_v0 }
 0x21a   : > { %1092 = vmatpush3.bf16.msra.mxu0 %v1212_v57 }
 0x21b   : > { %1093 = vmatprep.subr.bf16.mxu0 %v1373_v0 }
 0x21e   : > { %1094 = vmatpush3.bf16.msra.mxu0 %v1213_v58 }
 0x21f   : > { %1095 = vmatprep.subr.bf16.mxu0 %v1373_v0 }
 0x222   : > { %1096 = vmatpush3.bf16.msra.mxu0 %v1214_v5 }
 0x223   : > { %1097 = vmatprep.subr.bf16.mxu0 %v1373_v0 }
 0x226   : > { %1098 = vmatpush3.bf16.msra.mxu0 %v1215_v6 }
 0x2c9   : > { %v555_v60 = vpop.f32.mrf.mxu0 }
 0x2ca   : > { %v556_v61 = vadd.f32 %v927_v59, %v555_v60 }
 0x2cb   : > { %v1061_v62 = vpop.f32.mrf.mxu0 }
 0x2cc   : > { %v561_v63 = vadd.f32 %v556_v61, %v446_v48 }
 0x2cd   : > { %v558_v1 = vpop.f32.mrf.mxu0 }
 0x2ce   : > { %v562_v2 = vmax.f32 %v561_v63, 0.0 }
 0x2cf   : > { %v1062_v3 = vpop.f32.mrf.mxu0 }
 0x2d0   : > { %v563_v4 = vpack.c.bf16 %v562_v2, %v562_v2 }
 0x2d2   : > { %1080 = vmatmul.mubr.bf16.vlgmr.msra.gmra.mxu1 %v563_v4 }
 0x392   : > { %v671_v8 = vpop.f32.mrf.mxu1 }
 0x393   : > { %v672_v9 = vadd.f32 %v936_v7, %v671_v8 }
 0x394   : > { %v1081_v10 = vpop.f32.mrf.mxu1 }
 0x395   : > { %v677_v11 = vadd.f32 %v672_v9, %v562_v2 }
 0x396   : > { %v674_v12 = vpop.f32.mrf.mxu1 }
 0x397   : > { %v678_v13 = vmax.f32 %v677_v11, 0.0 }
 0x398   : > { %v1082_v14 = vpop.f32.mrf.mxu1 }
 0x399   : > { %v679_v15 = vpack.c.bf16 %v678_v13, %v678_v13 }
 0x39b   : > { %1100 = vmatmul.mubr.bf16.vlgmr.msra.gmra.mxu0 %v679_v15 }
 0x45b   : > { %v787_v0 = vpop.f32.mrf.mxu0 }
 0x45c   : > { %v788_v17 = vadd.f32 %v945_v16, %v787_v0 }
 0x45d   : > { %v1101_v18 = vpop.f32.mrf.mxu0 }
 0x45e   : > { %793 = vst [vmem:[%s214_s20] sm:$0xff] %v788_v17 }
 0x45f   : > { %v790_v19 = vpop.f32.mrf.mxu0 }
 0x460   : > { %1309 = shalt.err (!%p1306_p5)
}
 0x461   : > { %s1310_s24 = scalar_lea.hbm %s1595_s5, 128  ;;  %s1314_s26 = scalar_lea.hbm %s1641_s3, 256 }
 0x462   : > { %p1311_p2 = scmp.ne.s32.totalorder %s1595_s5, %s1310_s24  ;;  %p1315_p1 = scmp.lt.s32.totalorder %s1595_s5, %s1641_s3 }
 0x463   : > { %p1316_p4 = scmp.lt.s32.totalorder %s1314_s26, %s1310_s24 }
 0x464   : > { %p1312_p9 = pnand %p1311_p2, %p1656_p10 }
 0x465   : > { %p1317_p6 = por %p1316_p4, %p1315_p1 }
 0x466   : > { %p1313_p12 = pneg %p1312_p9 }
 0x468   : > { %p1318_p8 = pnand %p1317_p6, %p1313_p12 }
 0x46a   : > { %1321 = shalt.err (!%p1318_p8)
}
 0x46b   : > { %1113 = dma.vmem_to_hbm [thread:$0]  (%p1656_p10), %s1597_s28, 128, %s1595_s5, %s795_s8   ;;  %v1102_v20 = vpop.f32.mrf.mxu0 }
 0x46c PF: > { %s820_s6 = sand.u32 1, %s1352_s12   ;;  %p1657_p11 = scmp.ne.s32.totalorder %s1647_s19, 0 }
 0x46d   : > { %p1658_p7 = scmp.ge.s32.totalorder %s1364_s15, 2  ;;  %s821_s7 = scalar_lea.sflag [#allocation4], %s820_s6 }
 0x46f   : > { %p1127_p13 = pnand %p1658_p7, %p1657_p11 }
 0x471   : > { %p1128_p0 = pneg %p1127_p13 }
 0x473   : > { %1347 = dma.done.wait (%p1128_p0), %s821_s7, 128  }
 0x474   : > { %1349 = vsyncadd (%p1128_p0), %s821_s7, 4294967168  ;;  %p17_p3 = scmp.ge.s32.totalorder %s1476_s10, 4   ;;  %s1659_s12 = smov %s1356_s13 }
 0x475   : > { %s1660_s13 = smov %s1360_s14  ;;  %s1661_s14 = smov %s1485_s21 }
 0x476   : > { %s1662_s15 = smov %s1476_s10  ;;  %19 = sbr.rel (!%p17_p3) target bundleno = 6 (0x6), region = 93 }
 0x47b   :  { %826 = vsyncpa [#allocation3], 1 }
 0x47c   :  { %828 = vsyncpa [#allocation3 + $0x1], 1 }
 0x47d   :  { %829 = vsyncpa [#allocation6], 1 }
 0x47e   :  { %830 = vsyncpa [#allocation4], 1 }
 0x47f   :  { %832 = vsyncpa [#allocation4 + $0x1], 1 }

</bundles_post_ra>
